<compile_context>
chip_gen: v5e
topology: v5e:2x2
jax: 0.10.0
libtpu: 0.0.40
codegen_flags: <defaults>
</compile_context>

<pallas_src>
import math

import jax
import jax.numpy as jnp
from jax.experimental import pallas as pl
from jax.experimental.pallas import tpu as pltpu


def encoder_kernel(self_ref, adjn_ref, feats_ref, ws_ref, wn_ref,
                   out_ref, neigh_acc):
    """One (node-tile, feature-table-tile) grid step.

    self_ref  : [tn, D]  bf16  self features for this node tile
    adjn_ref  : [tn, tv] bf16  row-normalized adjacency slab (node tile x V tile)
    feats_ref : [tv, D]  bf16  feature-table tile (V is the reduction axis)
    ws_ref    : [D, E]   bf16  self half of the weight (pre-transposed)
    wn_ref    : [D, E]   bf16  neigh half of the weight (pre-transposed)
    out_ref   : [tn, E]  f32   output tile; VMEM-resident across the V axis,
                               doubles as the f32 accumulator for h
    neigh_acc : [tn, D]  f32   VMEM scratch, mean-aggregation accumulator
    """
    v = pl.program_id(1)

    @pl.when(v == 0)
    def _():
        neigh_acc[...] = jnp.zeros_like(neigh_acc)
        # Issue the self-feature matmul on the first reduction step so it
        # overlaps later feature-table DMAs instead of piling onto the last
        # step.  out_ref's block index is constant along V, so it stays in
        # VMEM and safely carries the partial h.
        out_ref[...] = jnp.dot(self_ref[...], ws_ref[...],
                               preferred_element_type=jnp.float32)

    # Mean aggregation as a pipelined MXU reduction over feature-table tiles.
    neigh_acc[...] += jnp.dot(adjn_ref[...], feats_ref[...],
                              preferred_element_type=jnp.float32)

    @pl.when(v == pl.num_programs(1) - 1)
    def _():
        neigh = neigh_acc[...]                                      # [tn, D] f32
        h = out_ref[...] + jnp.dot(neigh.astype(wn_ref.dtype), wn_ref[...],
                                   preferred_element_type=jnp.float32)
        out_ref[...] = jnp.tanh(h) + jnp.tanh(neigh)                # E == D


def encoder_forward(self_feats, adj_norm, all_feats, weight, *, tn=128, tv=256):
    """Returns combined.t() == [embed_dim, batch], matching the PyTorch module."""
    n, d = self_feats.shape
    v_nodes = all_feats.shape[0]
    e = weight.shape[0]
    assert weight.shape[1] == 2 * d, "weight must be [embed_dim, 2*feat_dim]"
    assert e == d, "residual `h + tanh(neigh)` requires embed_dim == feat_dim"
    assert adj_norm.shape == (n, v_nodes)

    tn = min(tn, n)
    tv = min(tv, v_nodes)
    assert n % tn == 0 and v_nodes % tv == 0
    assert d % 128 == 0 and e % 128 == 0 and tn % 8 == 0 and tv % 128 == 0

    # bf16 matmul inputs (f32 accumulation in-kernel).
    cdt = jnp.bfloat16
    self_b = self_feats.astype(cdt)
    adj_b = adj_norm.astype(cdt)
    feats_b = all_feats.astype(cdt)
    # Pre-transpose + split the weight in the wrapper (free layout plumbing):
    # W [E, 2D] -> W.T [2D, E] -> W_self [D, E], W_neigh [D, E].
    w_t = weight.T.astype(cdt)
    w_self = w_t[:d]
    w_neigh = w_t[d:]

    cost = pl.CostEstimate(
        flops=2 * n * v_nodes * d + 2 * n * (2 * d) * e,
        transcendentals=2 * n * e,
        bytes_accessed=(self_b.nbytes + adj_b.nbytes + feats_b.nbytes
                        + w_t.nbytes + n * e * 4),
    )

    out_ne = pl.pallas_call(
        encoder_kernel,
        out_shape=jax.ShapeDtypeStruct((n, e), jnp.float32),
        grid_spec=pltpu.PrefetchScalarGridSpec(
            num_scalar_prefetch=0,
            grid=(n // tn, v_nodes // tv),                       # reduction axis last
            in_specs=[
                pl.BlockSpec((tn, d), lambda i, vv: (i, 0)),     # self feats
                pl.BlockSpec((tn, tv), lambda i, vv: (i, vv)),   # adjacency slab
                pl.BlockSpec((tv, d), lambda i, vv: (vv, 0)),    # feature tile
                pl.BlockSpec((d, e), lambda i, vv: (0, 0)),      # W_self (resident)
                pl.BlockSpec((d, e), lambda i, vv: (0, 0)),      # W_neigh (resident)
            ],
            out_specs=pl.BlockSpec((tn, e), lambda i, vv: (i, 0)),
            scratch_shapes=[pltpu.VMEM((tn, d), jnp.float32)],
        ),
        compiler_params=pltpu.CompilerParams(
            dimension_semantics=("parallel", "arbitrary")),
        cost_estimate=cost,
    )(self_b, adj_b, feats_b, w_self, w_neigh)

    # PyTorch forward returns combined.t(); transpose outside the kernel so the
    # in-kernel stores stay lane-dense.
    return out_ne.T


def xavier_uniform(key, shape):
    # torch.nn.init.xavier_uniform_: bound = sqrt(6 / (fan_in + fan_out))
    fan_out, fan_in = shape
    bound = math.sqrt(6.0 / (fan_in + fan_out))
    return jax.random.uniform(key, shape, jnp.float32, -bound, bound)


if __name__ == "__main__":
    # Small but lane-aligned problem sizes (D, E multiples of 128; N mult of 8).
    V = 512         # total nodes in the graph
    N = 128         # batch of nodes to encode
    D = 128         # feat_dim
    E = 128         # embed_dim (must equal feat_dim for the residual add)

    key = jax.random.PRNGKey(0)
    k_feat, k_w = jax.random.split(key)

    # Feature table (plays the role of the nn.Embedding `features` lookup).
    all_feats = jax.random.normal(k_feat, (V, D), dtype=jnp.float32)

    # Deterministic ring graph: node i connected to i±1..i±4 (no self loops).
    idx = jnp.arange(V)
    adj = jnp.zeros((V, V), dtype=jnp.float32)
    for off in (1, 2, 3, 4):
        adj = adj.at[idx, (idx + off) % V].set(1.0)
        adj = adj.at[idx, (idx - off) % V].set(1.0)

    # Batch of nodes (deterministic).
    # TODO(synk): random neighbor sampling, the attention module, and the
    # radiation-noise augmentation branches are python/graph-level control flow
    # with no Pallas equivalent; only the dense-aggregation encoder path is ported.
    # TODO(synk): at real graph scale, replace the dense [N, V] adjacency matmul
    # with scalar-prefetched neighbor indices + row-gather DMA.
    nodes = jnp.arange(N)

    self_feats = all_feats[nodes]                             # [N, D] glue gather
    adj_rows = adj[nodes]                                     # [N, V]
    deg = jnp.maximum(adj_rows.sum(axis=1, keepdims=True), 1.0)
    adj_norm = adj_rows / deg                                 # row-normalized (mean agg)

    # Encoder weight: [embed_dim, 2 * feat_dim], xavier-uniform (gcn=False path).
    weight = xavier_uniform(k_w, (E, 2 * D))

    out = encoder_forward(self_feats, adj_norm, all_feats, weight)
    out = jax.block_until_ready(out)

    # Pure-JAX reference with the same bf16 inputs / f32 accumulation.
    cdt = jnp.bfloat16
    self_b = self_feats.astype(cdt)
    adj_b = adj_norm.astype(cdt)
    feats_b = all_feats.astype(cdt)
    w_t = weight.T.astype(cdt)
    neigh_ref = jnp.dot(adj_b, feats_b, preferred_element_type=jnp.float32)
    h_ref = (jnp.dot(self_b, w_t[:D], preferred_element_type=jnp.float32)
             + jnp.dot(neigh_ref.astype(cdt), w_t[D:],
                       preferred_element_type=jnp.float32))
    ref = (jnp.tanh(h_ref) + jnp.tanh(neigh_ref)).T

    assert out.shape == (E, N)
    assert jnp.allclose(out, ref, atol=2e-3, rtol=2e-3), (
        float(jnp.max(jnp.abs(out - ref))))

    print("KERNEL_OK")
</pallas_src>

<mosaic_0001>
module attributes {stable_mosaic.version = 11 : i64} {
  func.func @encoder_kernel(%arg0: i32, %arg1: i32, %arg2: memref<128x128xbf16, #tpu.memory_space<vmem>>, %arg3: memref<128x256xbf16, #tpu.memory_space<vmem>>, %arg4: memref<256x128xbf16, #tpu.memory_space<vmem>>, %arg5: memref<128x128xbf16, #tpu.memory_space<vmem>>, %arg6: memref<128x128xbf16, #tpu.memory_space<vmem>>, %arg7: memref<128x128xf32, #tpu.memory_space<vmem>>, %arg8: memref<128x128xf32, #tpu.memory_space<vmem>>) attributes {dimension_semantics = [#tpu.dimension_semantics<parallel>, #tpu.dimension_semantics<arbitrary>], iteration_bounds = array<i64: 1, 2>, scalar_prefetch = 0 : i64, scratch_operands = 1 : i64, tpu.core_type = #tpu.core_type<tc>, window_params = [{transform_indices = @transform_0, window_bounds = array<i64: 128, 128>}, {transform_indices = @transform_1, window_bounds = array<i64: 128, 256>}, {transform_indices = @transform_2, window_bounds = array<i64: 256, 128>}, {pipeline_mode = #tpu.pipeline_mode<synchronous>, transform_indices = @transform_3, window_bounds = array<i64: 128, 128>}, {pipeline_mode = #tpu.pipeline_mode<synchronous>, transform_indices = @transform_4, window_bounds = array<i64: 128, 128>}, {transform_indices = @transform_5, window_bounds = array<i64: 128, 128>}]} {
    %c0_i32 = arith.constant 0 : i32
    %0 = arith.cmpi eq, %arg1, %c0_i32 : i32
    %1 = arith.extui %0 : i1 to i32
    %c0_i32_0 = arith.constant 0 : i32
    %2 = arith.cmpi ne, %1, %c0_i32_0 : i32
    scf.if %2 {
      %cst_9 = arith.constant 0.000000e+00 : f32
      %12 = vector.broadcast %cst_9 : f32 to vector<128x128xf32>
      %c0_10 = arith.constant 0 : index
      %c0_11 = arith.constant 0 : index
      %13 = vector.load %arg8[%c0_10, %c0_11] : memref<128x128xf32, #tpu.memory_space<vmem>>, vector<128x128xf32>
      tpu.vector_store %arg8[%c0_10, %c0_11], %12 {strides = array<i32>} : memref<128x128xf32, #tpu.memory_space<vmem>>, vector<128x128xf32>,
      %c0_12 = arith.constant 0 : index
      %c0_13 = arith.constant 0 : index
      %14 = vector.load %arg2[%c0_12, %c0_13] : memref<128x128xbf16, #tpu.memory_space<vmem>>, vector<128x128xbf16>
      %c0_14 = arith.constant 0 : index
      %c0_15 = arith.constant 0 : index
      %15 = vector.load %arg5[%c0_14, %c0_15] : memref<128x128xbf16, #tpu.memory_space<vmem>>, vector<128x128xbf16>
      %cst_16 = arith.constant dense<0.000000e+00> : vector<128x128xf32>
      %16 = tpu.matmul %14, %15, %cst_16 {dimension_numbers = #tpu.dot_dimension_numbers<[1], [0], [0], [1], [0, 0, 1, 1], [], []>} : vector<128x128xbf16>, vector<128x128xbf16>, vector<128x128xf32> -> vector<128x128xf32>
      %c0_17 = arith.constant 0 : index
      %c0_18 = arith.constant 0 : index
      %17 = vector.load %arg7[%c0_17, %c0_18] : memref<128x128xf32, #tpu.memory_space<vmem>>, vector<128x128xf32>
      tpu.vector_store %arg7[%c0_17, %c0_18], %16 {strides = array<i32>} : memref<128x128xf32, #tpu.memory_space<vmem>>, vector<128x128xf32>,
    } else {
    }
    %c0 = arith.constant 0 : index
    %c0_1 = arith.constant 0 : index
    %3 = vector.load %arg8[%c0, %c0_1] : memref<128x128xf32, #tpu.memory_space<vmem>>, vector<128x128xf32>
    %c0_2 = arith.constant 0 : index
    %c0_3 = arith.constant 0 : index
    %4 = vector.load %arg3[%c0_2, %c0_3] : memref<128x256xbf16, #tpu.memory_space<vmem>>, vector<128x256xbf16>
    %c0_4 = arith.constant 0 : index
    %c0_5 = arith.constant 0 : index
    %5 = vector.load %arg4[%c0_4, %c0_5] : memref<256x128xbf16, #tpu.memory_space<vmem>>, vector<256x128xbf16>
    %cst = arith.constant dense<0.000000e+00> : vector<128x128xf32>
    %6 = tpu.matmul %4, %5, %cst {dimension_numbers = #tpu.dot_dimension_numbers<[1], [0], [0], [1], [0, 0, 1, 1], [], []>} : vector<128x256xbf16>, vector<256x128xbf16>, vector<128x128xf32> -> vector<128x128xf32>
    %7 = arith.addf %3, %6 : vector<128x128xf32>
    %c0_6 = arith.constant 0 : index
    %c0_7 = arith.constant 0 : index
    %8 = vector.load %arg8[%c0_6, %c0_7] : memref<128x128xf32, #tpu.memory_space<vmem>>, vector<128x128xf32>
    tpu.vector_store %arg8[%c0_6, %c0_7], %7 {strides = array<i32>} : memref<128x128xf32, #tpu.memory_space<vmem>>, vector<128x128xf32>,
    %c1_i32 = arith.constant 1 : i32
    %9 = arith.cmpi eq, %arg1, %c1_i32 : i32
    %10 = arith.extui %9 : i1 to i32
    %c0_i32_8 = arith.constant 0 : i32
    %11 = arith.cmpi ne, %10, %c0_i32_8 : i32
    scf.if %11 {
      %c0_9 = arith.constant 0 : index
      %c0_10 = arith.constant 0 : index
      %12 = vector.load %arg8[%c0_9, %c0_10] : memref<128x128xf32, #tpu.memory_space<vmem>>, vector<128x128xf32>
      %c0_11 = arith.constant 0 : index
      %c0_12 = arith.constant 0 : index
      %13 = vector.load %arg7[%c0_11, %c0_12] : memref<128x128xf32, #tpu.memory_space<vmem>>, vector<128x128xf32>
      %14 = arith.truncf %12 : vector<128x128xf32> to vector<128x128xbf16>
      %c0_13 = arith.constant 0 : index
      %c0_14 = arith.constant 0 : index
      %15 = vector.load %arg6[%c0_13, %c0_14] : memref<128x128xbf16, #tpu.memory_space<vmem>>, vector<128x128xbf16>
      %cst_15 = arith.constant dense<0.000000e+00> : vector<128x128xf32>
      %16 = tpu.matmul %14, %15, %cst_15 {dimension_numbers = #tpu.dot_dimension_numbers<[1], [0], [0], [1], [0, 0, 1, 1], [], []>} : vector<128x128xbf16>, vector<128x128xbf16>, vector<128x128xf32> -> vector<128x128xf32>
      %17 = arith.addf %13, %16 : vector<128x128xf32>
      %18 = math.tanh %17 : vector<128x128xf32>
      %19 = math.tanh %12 : vector<128x128xf32>
      %20 = arith.addf %18, %19 : vector<128x128xf32>
      %c0_16 = arith.constant 0 : index
      %c0_17 = arith.constant 0 : index
      %21 = vector.load %arg7[%c0_16, %c0_17] : memref<128x128xf32, #tpu.memory_space<vmem>>, vector<128x128xf32>
      tpu.vector_store %arg7[%c0_16, %c0_17], %20 {strides = array<i32>} : memref<128x128xf32, #tpu.memory_space<vmem>>, vector<128x128xf32>,
    } else {
    }
    return
  }
  func.func @transform_0(%arg0: i32, %arg1: i32) -> (i32, i32) {
    %c0_i32 = arith.constant 0 : i32
    %c0_i32_0 = arith.constant 0 : i32
    return %arg0, %c0_i32 : i32, i32
  }
  func.func @transform_1(%arg0: i32, %arg1: i32) -> (i32, i32) {
    %c0_i32 = arith.constant 0 : i32
    return %arg0, %arg1 : i32, i32
  }
  func.func @transform_2(%arg0: i32, %arg1: i32) -> (i32, i32) {
    %c0_i32 = arith.constant 0 : i32
    %c0_i32_0 = arith.constant 0 : i32
    return %arg1, %c0_i32 : i32, i32
  }
  func.func @transform_3(%arg0: i32, %arg1: i32) -> (i32, i32) {
    %c0_i32 = arith.constant 0 : i32
    %c0_i32_0 = arith.constant 0 : i32
    %c0_i32_1 = arith.constant 0 : i32
    return %c0_i32, %c0_i32_0 : i32, i32
  }
  func.func @transform_4(%arg0: i32, %arg1: i32) -> (i32, i32) {
    %c0_i32 = arith.constant 0 : i32
    %c0_i32_0 = arith.constant 0 : i32
    %c0_i32_1 = arith.constant 0 : i32
    return %c0_i32, %c0_i32_0 : i32, i32
  }
  func.func @transform_5(%arg0: i32, %arg1: i32) -> (i32, i32) {
    %c0_i32 = arith.constant 0 : i32
    %c0_i32_0 = arith.constant 0 : i32
    return %arg0, %c0_i32 : i32, i32
  }
}

</mosaic_0001>

<bundles_post_ra>
// kernel: tpu_custom_call.1
= control target key start
LH: loop header
LB: loop body
LE: loop exit
PB: predicated region body
PF: predicated region fallthrough
CT: control target
= control target key end

     0   :  { %s2387_s0 = inlined_call_operand.hbm [shape: bf16[128,128], index: 0, kind: input, shape index: {}]   ;;  %s2388_s1 = inlined_call_operand.hbm [shape: bf16[128,512], index: 1, kind: input, shape index: {}]   ;;  %s2389_s2 = inlined_call_operand.hbm [shape: bf16[512,128], index: 2, kind: input, shape index: {}]   ;;  %s2390_s3 = inlined_call_operand.hbm [shape: bf16[128,128], index: 3, kind: input, shape index: {}]   ;;  %s2391_s4 = inlined_call_operand.hbm [shape: bf16[128,128], index: 4, kind: input, shape index: {}]   ;;  %s2392_s5 = inlined_call_operand.hbm [shape: f32[128,128], index: 5, kind: output, shape index: {}]  }
   0x1   :  { %2398 = sst [smem:[#allocation19_spill]] %s2388_s1 }
   0x2   :  { %2399 = sst [smem:[#allocation20_spill]] %s2390_s3 }
   0x3   :  { %10 = vsyncpa [#allocation4], 0 }
   0x4   :  { %11 = vsyncpa [#allocation7], 0 }
   0x5   :  { %13 = vsyncpa [#allocation7 + $0x1], 0 }
   0x6   :  { %14 = vsyncpa [#allocation10], 0 }
   0x7   :  { %15 = vsyncpa [#allocation5], 0  ;;  %s2132_s18 = smov 0   ;;  %s2134_s19 = smov 0  }
   0x8   :  { %s2136_s20 = smov 0   ;;  %s2138_s21 = smov 0  }
   0x9   :  { %s2140_s22 = smov 0   ;;  %s2142_s23 = smov 0  }
   0xa LB: > { %s2161_s24 = sadd.s32 4294967295, %s2088_s23   ;;  %p81_p0 = scmp.ne.s32.totalorder %s2072_s19, %s2068_s18  ;;  %s2088_s23 = sphi %s2142_s23, %s21_s23   ;;  %s2084_s22 = sphi %s2140_s22, %s2417_s22   ;;  %s2080_s21 = sphi %s2138_s21, %s2416_s21   ;;  %s2076_s20 = sphi %s2136_s20, %s2415_s20   ;;  %s2072_s19 = sphi %s2134_s19, %s2414_s19   ;;  %s2068_s18 = sphi %s2132_s18, %s2413_s18  }
   0xb   : > { %p82_p1 = scmp.eq.s32.totalorder %s2161_s24, 0  ;;  %p1309_p2 = scmp.ge.s32.totalorder %s2088_s23, 1 }
   0xc   : > { %p186_p3 = scmp.lt.s32.totalorder %s2088_s23, 3  ;;  %s2402_s3 = sld [smem:[#allocation20_spill]] }
   0xd   : > { %p2169_p4 = por %p82_p1, %p81_p0  ;;  %s2090_s30 = smov [#allocation9]  }
   0xe   : > { %p2173_p5 = pnand %p1309_p2, %p186_p3  ;;  %s216_s6 = sshll.u32 %s2090_s30, 4  ;;  %s217_s6 = int_to_ptr.vmem [resolvable:$true] %s216_s6 }
   0xf   : > { %s2393_s8 = smov 64   ;;  %s2395_s9 = smov 4  }
  0x10   : > { %p1698_p6 = pneg %p2173_p5  ;;  %s30_s10 = sadd.s32 1, %s2084_s22 }
  0x11   : > { %p31_p8 = scmp.ge.s32.totalorder %s30_s10, 2  ;;  %s68_s11 = sadd.s32 1, %s2076_s20 }
  0x12   : > { %s214_s29 = sshll.u32 %s2402_s3, 4  ;;  %p2184_p7 = pnand %p1698_p6, %p82_p1  ;;  %s215_s29 = int_to_ptr.hbm [resolvable:$true] %s214_s29 }
  0x13   : > { %p75_p9 = scmp.ne.s32.totalorder %s2076_s20, %s2072_s19  ;;  %p76_p10 = scmp.eq.s32.totalorder %s2088_s23, 0 }
  0x14   : > { %1704 = dma.hbm_to_vmem [thread:$0]  (!%p2184_p7), %s215_s29, 1024, %s217_s6, [#allocation10], %s2393_s8, %s2393_s8, %s2395_s9  }
  0x15   : > { %s2419_s10 = smov (%p31_p8, %s30_s10), 0  ;;  %p2200_p11 = por %p76_p10, %p75_p9 }
  0x16   : > { %2404 = sst [smem:[#allocation17_spill]] %s2419_s10  ;;  %p1718_p12 = scmp.lt.s32.totalorder %s2088_s23, 2 }
  0x17   : > { %s64_s13 = ssub.s32 %s2084_s22, %s2419_s10  ;;  %s244_s14 = sand.u32 1, %s2088_s23  }
  0x18   : > { %p66_p13 = scmp.eq.s32.totalorder %s64_s13, 0  ;;  %s246_s15 = sand.u32 1, %s2076_s20  }
  0x19   : > { %s1556_s16 = sshll.u32 %s2084_s22, 3  ;;  %s2213_s18 = sshll.u32 %s246_s15, 7 }
  0x1a   : > { %s2211_s17 = scalar_select %p66_p13, %s2076_s20, %s68_s11  }
  0x1b   : > { %s2407_s1 = sld [smem:[#allocation19_spill]]  ;;  %s248_s6 = scalar_lea.vmem [#allocation6], %s2213_s18 }
  0x1c   : > { %2406 = sst [smem:[#allocation18_spill]] %s2211_s17  ;;  %s259_s8 = sshll.u32 %s248_s6, 4  ;;  %s260_s8 = int_to_ptr.vmem [resolvable:$true] %s259_s8 }
  0x1d   : > { %p2223_p0 = pnand %p1718_p12, %p2200_p11  ;;  %s245_s11 = scalar_lea.sflag [#allocation7], %s244_s14 }
  0x1e   : > { %s2093_s15 = smov 256   ;;  %s2094_s27 = smov 128  }
  0x1f   : > { %s2095_s28 = smov 8   ;;  %s200_s6 = sshll.u32 %s2387_s0, 4  ;;  %s201_s6 = int_to_ptr.hbm [resolvable:$true] %s200_s6 }
  0x20   : > { %s2096_s3 = smov [#allocation3]   ;;  %s2409_s10 = smov 4  }
  0x21   : > { %s256_s29 = scalar_lea.hbm %s2407_s1, %s1556_s16  ;;  %s228_s1 = sshll.u32 %s2391_s4, 4  ;;  %s229_s1 = int_to_ptr.hbm [resolvable:$true] %s228_s1 }
  0x22   : > { %s257_s30 = sshll.u32 %s256_s29, 4  ;;  %s202_s14 = sshll.u32 %s2096_s3, 4  ;;  %s258_s30 = int_to_ptr.hbm [resolvable:$true] %s257_s30  ;;  %s203_s14 = int_to_ptr.vmem [resolvable:$true] %s202_s14 }
  0x23   : > { %1711 = dma.hbm_to_vmem [thread:$0]  (!%p2223_p0), %s258_s30, 2048, %s260_s8, %s245_s11, %s2093_s15, %s2094_s27, %s2095_s28  }
  0x24   : > { %s2410_s17 = smov 64   ;;  %s2097_s8 = smov [#allocation11]  }
  0x25   : > { %1701 = dma.hbm_to_vmem [thread:$0]  (!%p2184_p7), %s201_s6, 1024, %s203_s14, [#allocation4], %s2410_s17, %s2410_s17, %s2409_s10  }
  0x26   : > { %s230_s30 = sshll.u32 %s2097_s8, 4  ;;  %s1557_s15 = sshll.u32 %s2084_s22, 7  ;;  %s231_s30 = int_to_ptr.vmem [resolvable:$true] %s230_s30 }
  0x27   : > { %1707 = dma.hbm_to_vmem [thread:$0]  (!%p2184_p7), %s229_s1, 1024, %s231_s30, [#allocation10], %s2410_s17, %s2410_s17, %s2409_s10  }
  0x28   : > { %s278_s3 = scalar_lea.hbm %s2389_s2, %s1557_s15  ;;  %s273_s28 = scalar_lea.vmem [#allocation8], %s2213_s18 }
  0x29   : > { %s281_s16 = sshll.u32 %s273_s28, 4  ;;  %s279_s29 = sshll.u32 %s278_s3, 4  ;;  %s282_s16 = int_to_ptr.vmem [resolvable:$true] %s281_s16  ;;  %s280_s29 = int_to_ptr.hbm [resolvable:$true] %s279_s29 }
  0x2a   : > { %1714 = dma.hbm_to_vmem [thread:$0]  (!%p2223_p0), %s280_s29, 2048, %s282_s16, %s245_s11, %s2410_s17, %s2410_s17, %s2409_s10  }
  0x2b   : > { %293 = sbr.rel (%p2173_p5) target bundleno = 687 (0x2af), region = 40 }
  0x30   : > { %2051 = dma.done.wait (%p82_p1), [#allocation4], 1024  }
  0x31   : > { %2053 = vsyncadd (%p82_p1), [#allocation4], 4294966272  ;;  %s300_s1 = sand.u32 1, %s2161_s24   ;;  %s302_s7 = sand.u32 1, %s2072_s19  }
  0x32   : > { %s1322_s18 = sshll.u32 %s302_s7, 7  ;;  %s301_s13 = scalar_lea.sflag [#allocation7], %s300_s1 }
  0x33   : > { %s2263_s6 = scalar_lea.vmem [#allocation6], %s1322_s18 }
  0x34   : > { %2055 = dma.done.wait (%p2169_p4), %s301_s13, 4096  }
  0x35   : > { %2057 = vsyncadd (%p2169_p4), %s301_s13, 4294963200  ;;  %s2269_s26 = scalar_lea.vmem [#allocation8], %s1322_s18 }
  0x36   : > { %2059 = dma.done.wait (%p82_p1), [#allocation10], 2048  }
  0x37   : > { %2061 = vsyncadd (%p82_p1), [#allocation10], 4294965248  ;;  %p1326_p2 = scmp.ne.s32.totalorder %s2080_s21, 0 }
  0x39   : > { %360 = sbr.rel (%p1326_p2) target bundleno = 253 (0xfd), region = 64 }
  0x3e   : > { %v1573_v0 = vld [vmem:[#allocation9 + $0x38] sm:$0xff]  ;;  %v2098_v1 = vmov 0.0   ;;  %v1572_v2 = vld [vmem:[#allocation9 + $0x30] sm:$0xff]  ;;  %v1571_v3 = vld [vmem:[#allocation9 + $0x28] sm:$0xff] }
  0x3f   : > { %361 = vst [vmem:[#allocation2 + $0x30] sm:$0xff] %v2098_v1  ;;  %505 = vmatpush.bf16.msra.mxu0 %v1573_v0  ;;  %1614 = vmatpush.bf16.msra.mxu1 %v1573_v0  ;;  %v1570_v4 = vld [vmem:[#allocation9 + $0x20] sm:$0xff]  ;;  %v1569_v5 = vld [vmem:[#allocation9 + $0x18] sm:$0xff]  ;;  %v1568_v6 = vld [vmem:[#allocation9 + $0x10] sm:$0xff] }
  0x40   : > { %362 = vst [vmem:[#allocation2] sm:$0xff] %v2098_v1  ;;  %1615 = vmatpush.bf16.msra.mxu2 %v1573_v0  ;;  %1616 = vmatpush.bf16.msra.mxu3 %v1573_v0  ;;  %v1567_v7 = vld [vmem:[#allocation9 + $0x8] sm:$0xff]  ;;  %v1566_v8 = vld [vmem:[#allocation9] sm:$0xff]  ;;  %v1560_v10 = vld [vmem:[#allocation3 + $0x10] sm:$0xff] }
  0x41   : > { %363 = vst [vmem:[#allocation2 + $0x58] sm:$0xff] %v2098_v1  ;;  %v1558_v9 = vld [vmem:[#allocation3] sm:$0xff]  ;;  %v1564_v12 = vld [vmem:[#allocation3 + $0x30] sm:$0xff]  ;;  %v1559_v13 = vld [vmem:[#allocation3 + $0x8] sm:$0xff] }
  0x42   : > { %364 = vst [vmem:[#allocation2 + $0x18] sm:$0xff] %v2098_v1  ;;  %v1562_v11 = vld [vmem:[#allocation3 + $0x20] sm:$0xff]  ;;  %v1561_v14 = vld [vmem:[#allocation3 + $0x18] sm:$0xff]  ;;  %v1563_v15 = vld [vmem:[#allocation3 + $0x28] sm:$0xff] }
  0x43   : > { %365 = vst [vmem:[#allocation2 + $0x50] sm:$0xff] %v2098_v1  ;;  %506 = vmatpush.bf16.msra.mxu0 %v1572_v2  ;;  %1617 = vmatpush.bf16.msra.mxu1 %v1572_v2  ;;  %v1565_v16 = vld [vmem:[#allocation3 + $0x38] sm:$0xff] }
  0x44   : > { %366 = vst [vmem:[#allocation2 + $0x68] sm:$0xff] %v2098_v1  ;;  %1618 = vmatpush.bf16.msra.mxu2 %v1572_v2  ;;  %1619 = vmatpush.bf16.msra.mxu3 %v1572_v2 }
  0x45   : > { %367 = vst [vmem:[#allocation2 + $0x8] sm:$0xff] %v2098_v1 }
  0x46   : > { %368 = vst [vmem:[#allocation2 + $0x48] sm:$0xff] %v2098_v1 }
  0x47   : > { %369 = vst [vmem:[#allocation2 + $0x40] sm:$0xff] %v2098_v1  ;;  %507 = vmatpush.bf16.msra.mxu0 %v1571_v3  ;;  %1620 = vmatpush.bf16.msra.mxu1 %v1571_v3 }
  0x48   : > { %370 = vst [vmem:[#allocation2 + $0x20] sm:$0xff] %v2098_v1  ;;  %1621 = vmatpush.bf16.msra.mxu2 %v1571_v3  ;;  %1622 = vmatpush.bf16.msra.mxu3 %v1571_v3 }
  0x49   : > { %371 = vst [vmem:[#allocation2 + $0x10] sm:$0xff] %v2098_v1 }
  0x4a   : > { %372 = vst [vmem:[#allocation2 + $0x38] sm:$0xff] %v2098_v1 }
  0x4b   : > { %373 = vst [vmem:[#allocation2 + $0x60] sm:$0xff] %v2098_v1  ;;  %508 = vmatpush.bf16.msra.mxu0 %v1570_v4  ;;  %1623 = vmatpush.bf16.msra.mxu1 %v1570_v4 }
  0x4c   : > { %374 = vst [vmem:[#allocation2 + $0x70] sm:$0xff] %v2098_v1  ;;  %1624 = vmatpush.bf16.msra.mxu2 %v1570_v4  ;;  %1625 = vmatpush.bf16.msra.mxu3 %v1570_v4 }
  0x4d   : > { %375 = vst [vmem:[#allocation2 + $0x78] sm:$0xff] %v2098_v1 }
  0x4e   : > { %376 = vst [vmem:[#allocation2 + $0x28] sm:$0xff] %v2098_v1 }
  0x4f   : > { %509 = vmatpush.bf16.msra.mxu0 %v1569_v5  ;;  %1626 = vmatpush.bf16.msra.mxu1 %v1569_v5 }
  0x50   : > { %1627 = vmatpush.bf16.msra.mxu2 %v1569_v5  ;;  %1628 = vmatpush.bf16.msra.mxu3 %v1569_v5 }
  0x53   : > { %510 = vmatpush.bf16.msra.mxu0 %v1568_v6  ;;  %1629 = vmatpush.bf16.msra.mxu1 %v1568_v6 }
  0x54   : > { %1630 = vmatpush.bf16.msra.mxu2 %v1568_v6  ;;  %1631 = vmatpush.bf16.msra.mxu3 %v1568_v6 }
  0x57   : > { %511 = vmatpush.bf16.msra.mxu0 %v1567_v7  ;;  %1632 = vmatpush.bf16.msra.mxu1 %v1567_v7 }
  0x58   : > { %1633 = vmatpush.bf16.msra.mxu2 %v1567_v7  ;;  %1634 = vmatpush.bf16.msra.mxu3 %v1567_v7 }
  0x5b   : > { %512 = vmatpush.bf16.msra.mxu0 %v1566_v8  ;;  %1635 = vmatpush.bf16.msra.mxu1 %v1566_v8 }
  0x5c   : > { %1636 = vmatpush.bf16.msra.mxu2 %v1566_v8  ;;  %1637 = vmatpush.bf16.msra.mxu3 %v1566_v8 }
  0x5e   : > { %513 = vmatmul.bf16.vlgmr.msra.gmra.mxu0 %v1558_v9  ;;  %523 = vmatmul.bf16.vlgmr.msra.gmra.mxu1 %v1560_v10 }
  0x5f   : > { %533 = vmatmul.bf16.vlgmr.msra.gmra.mxu2 %v1562_v11  ;;  %543 = vmatmul.bf16.vlgmr.msra.gmra.mxu3 %v1564_v12 }
  0x6e   : > { %518 = vmatmul.bf16.gmra.mxu0 %v1559_v13  ;;  %528 = vmatmul.bf16.gmra.mxu1 %v1561_v14 }
  0x6f   : > { %538 = vmatmul.bf16.gmra.mxu2 %v1563_v15  ;;  %548 = vmatmul.bf16.gmra.mxu3 %v1565_v16 }
  0xdb   : > { %v514_v17 = vpop.f32.mrf.mxu0  ;;  %v524_v18 = vpop.f32.mrf.mxu1 }
  0xdc   : > { %554 = vst [vmem:[#allocation12] sm:$0xff] %v514_v17 }
  0xdd   : > { %558 = vst [vmem:[#allocation12 + $0x20] sm:$0xff] %v524_v18 }
  0xe2   : > { %v534_v19 = vpop.f32.mrf.mxu2  ;;  %v544_v20 = vpop.f32.mrf.mxu3 }
  0xe3   : > { %562 = vst [vmem:[#allocation12 + $0x40] sm:$0xff] %v534_v19  ;;  %v516_v21 = vpop.f32.mrf.mxu0  ;;  %v526_v22 = vpop.f32.mrf.mxu1 }
  0xe4   : > { %566 = vst [vmem:[#allocation12 + $0x60] sm:$0xff] %v544_v20 }
  0xe5   : > { %555 = vst [vmem:[#allocation12 + $0x8] sm:$0xff] %v516_v21 }
  0xe6   : > { %559 = vst [vmem:[#allocation12 + $0x28] sm:$0xff] %v526_v22 }
  0xea   : > { %v536_v23 = vpop.f32.mrf.mxu2  ;;  %v546_v24 = vpop.f32.mrf.mxu3 }
  0xeb   : > { %563 = vst [vmem:[#allocation12 + $0x48] sm:$0xff] %v536_v23  ;;  %v519_v25 = vpop.f32.mrf.mxu0  ;;  %v529_v26 = vpop.f32.mrf.mxu1 }
  0xec   : > { %567 = vst [vmem:[#allocation12 + $0x68] sm:$0xff] %v546_v24 }
  0xed   : > { %556 = vst [vmem:[#allocation12 + $0x10] sm:$0xff] %v519_v25 }
  0xee   : > { %560 = vst [vmem:[#allocation12 + $0x30] sm:$0xff] %v529_v26 }
  0xf2   : > { %v539_v27 = vpop.f32.mrf.mxu2  ;;  %v549_v28 = vpop.f32.mrf.mxu3 }
  0xf3   : > { %564 = vst [vmem:[#allocation12 + $0x50] sm:$0xff] %v539_v27  ;;  %v521_v29 = vpop.f32.mrf.mxu0  ;;  %v531_v30 = vpop.f32.mrf.mxu1 }
  0xf4   : > { %568 = vst [vmem:[#allocation12 + $0x70] sm:$0xff] %v549_v28 }
  0xf5   : > { %557 = vst [vmem:[#allocation12 + $0x18] sm:$0xff] %v521_v29 }
  0xf6   : > { %561 = vst [vmem:[#allocation12 + $0x38] sm:$0xff] %v531_v30 }
  0xfa   : > { %v541_v31 = vpop.f32.mrf.mxu2  ;;  %v551_v32 = vpop.f32.mrf.mxu3 }
  0xfb   : > { %565 = vst [vmem:[#allocation12 + $0x58] sm:$0xff] %v541_v31 }
  0xfc   : > { %569 = vst [vmem:[#allocation12 + $0x78] sm:$0xff] %v551_v32 }
  0xfd PF: > { %v1597_v33 = vld [vmem:[%s2269_s26 + $0x38] sm:$0xff]  ;;  %v1596_v35 = vld [vmem:[%s2269_s26 + $0x30] sm:$0xff]  ;;  %v1595_v37 = vld [vmem:[%s2269_s26 + $0x28] sm:$0xff]  ;;  %p1519_p1 = scmp.ne.s32.totalorder %s2080_s21, 1 }
  0xfe   : > { %v1605_v34 = vld [vmem:[%s2269_s26 + $0x78] sm:$0xff]  ;;  %810 = vmatpush.bf16.msra.mxu0 %v1597_v33  ;;  %1638 = vmatpush.bf16.msra.mxu2 %v1597_v33  ;;  %v1604_v36 = vld [vmem:[%s2269_s26 + $0x70] sm:$0xff]  ;;  %v1603_v38 = vld [vmem:[%s2269_s26 + $0x68] sm:$0xff] }
  0xff   : > { %859 = vmatpush.bf16.msra.mxu1 %v1605_v34  ;;  %1646 = vmatpush.bf16.msra.mxu3 %v1605_v34  ;;  %v1594_v39 = vld [vmem:[%s2269_s26 + $0x20] sm:$0xff]  ;;  %v1593_v41 = vld [vmem:[%s2269_s26 + $0x18] sm:$0xff]  ;;  %v1592_v43 = vld [vmem:[%s2269_s26 + $0x10] sm:$0xff] }
 0x100   : > { %v1602_v40 = vld [vmem:[%s2269_s26 + $0x60] sm:$0xff]  ;;  %v1601_v42 = vld [vmem:[%s2269_s26 + $0x58] sm:$0xff]  ;;  %v1600_v44 = vld [vmem:[%s2269_s26 + $0x50] sm:$0xff] }
 0x101   : > { %v1591_v45 = vld [vmem:[%s2269_s26 + $0x8] sm:$0xff]  ;;  %v1590_v47 = vld [vmem:[%s2269_s26] sm:$0xff]  ;;  %v1401_v61 = vld [vmem:[%s2263_s6 + $0x10] sm:$0xf] }
 0x102   : > { %811 = vmatpush.bf16.msra.mxu0 %v1596_v35  ;;  %1639 = vmatpush.bf16.msra.mxu2 %v1596_v35  ;;  %v1599_v46 = vld [vmem:[%s2269_s26 + $0x48] sm:$0xff]  ;;  %v1598_v48 = vld [vmem:[%s2269_s26 + $0x40] sm:$0xff]  ;;  %v1577_v62 = vld [vmem:[%s2263_s6 + $0x14] sm:$0xf0] }
 0x103   : > { %860 = vmatpush.bf16.msra.mxu1 %v1604_v36  ;;  %1647 = vmatpush.bf16.msra.mxu3 %v1604_v36  ;;  %v1393_v49 = vld [vmem:[%s2263_s6] sm:$0xf]  ;;  %v1575_v50 = vld [vmem:[%s2263_s6 + $0x4] sm:$0xf0]  ;;  %v1574_v53 = vld [vmem:[%s2263_s6 + $0x4] sm:$0xf]  ;;  %v1402_v5 = vor.u32 %v1577_v62, %v1401_v61 }
 0x104   : > { %v1425_v51 = vld [vmem:[%s2263_s6 + $0x40] sm:$0xf]  ;;  %v1583_v52 = vld [vmem:[%s2263_s6 + $0x44] sm:$0xf0]  ;;  %v1395_v54 = vld [vmem:[%s2263_s6 + $0x8] sm:$0xf0]  ;;  %v1394_v57 = vor.u32 %v1575_v50, %v1393_v49 }
 0x105   : > { %v1582_v55 = vld [vmem:[%s2263_s6 + $0x44] sm:$0xf]  ;;  %v1427_v56 = vld [vmem:[%s2263_s6 + $0x48] sm:$0xf0]  ;;  %v1426_v58 = vor.u32 %v1583_v52, %v1425_v51  ;;  %v1398_v59 = vor.u32 %v1574_v53, %v1395_v54  ;;  %v1433_v63 = vld [vmem:[%s2263_s6 + $0x50] sm:$0xf] }
 0x106   : > { %812 = vmatpush.bf16.msra.mxu0 %v1595_v37  ;;  %1640 = vmatpush.bf16.msra.mxu2 %v1595_v37  ;;  %v1430_v60 = vor.u32 %v1582_v55, %v1427_v56  ;;  %v1585_v0 = vld [vmem:[%s2263_s6 + $0x54] sm:$0xf0]  ;;  %v1576_v1 = vld [vmem:[%s2263_s6 + $0x14] sm:$0xf]  ;;  %v1403_v2 = vld [vmem:[%s2263_s6 + $0x18] sm:$0xf0] }
 0x107   : > { %861 = vmatpush.bf16.msra.mxu1 %v1603_v38  ;;  %1648 = vmatpush.bf16.msra.mxu3 %v1603_v38  ;;  %v1584_v3 = vld [vmem:[%s2263_s6 + $0x54] sm:$0xf]  ;;  %v1435_v4 = vld [vmem:[%s2263_s6 + $0x58] sm:$0xf0]  ;;  %v1434_v6 = vor.u32 %v1585_v0, %v1433_v63  ;;  %v1406_v7 = vor.u32 %v1576_v1, %v1403_v2  ;;  %v1409_v9 = vld [vmem:[%s2263_s6 + $0x20] sm:$0xf] }
 0x108   : > { %v1438_v8 = vor.u32 %v1584_v3, %v1435_v4  ;;  %v1579_v10 = vld [vmem:[%s2263_s6 + $0x24] sm:$0xf0]  ;;  %v1441_v11 = vld [vmem:[%s2263_s6 + $0x60] sm:$0xf]  ;;  %v1578_v13 = vld [vmem:[%s2263_s6 + $0x24] sm:$0xf] }
 0x109   : > { %v1587_v12 = vld [vmem:[%s2263_s6 + $0x64] sm:$0xf0]  ;;  %v1411_v14 = vld [vmem:[%s2263_s6 + $0x28] sm:$0xf0]  ;;  %v1586_v15 = vld [vmem:[%s2263_s6 + $0x64] sm:$0xf]  ;;  %v1410_v17 = vor.u32 %v1579_v10, %v1409_v9 }
 0x10a   : > { %813 = vmatpush.bf16.msra.mxu0 %v1594_v39  ;;  %1641 = vmatpush.bf16.msra.mxu2 %v1594_v39  ;;  %v1443_v16 = vld [vmem:[%s2263_s6 + $0x68] sm:$0xf0]  ;;  %v1442_v18 = vor.u32 %v1587_v12, %v1441_v11  ;;  %v1414_v19 = vor.u32 %v1578_v13, %v1411_v14  ;;  %v1417_v21 = vld [vmem:[%s2263_s6 + $0x30] sm:$0xf]  ;;  %v1581_v22 = vld [vmem:[%s2263_s6 + $0x34] sm:$0xf0] }
 0x10b   : > { %862 = vmatpush.bf16.msra.mxu1 %v1602_v40  ;;  %1649 = vmatpush.bf16.msra.mxu3 %v1602_v40  ;;  %v1446_v20 = vor.u32 %v1586_v15, %v1443_v16  ;;  %v1449_v23 = vld [vmem:[%s2263_s6 + $0x70] sm:$0xf]  ;;  %v1589_v24 = vld [vmem:[%s2263_s6 + $0x74] sm:$0xf0]  ;;  %v1580_v25 = vld [vmem:[%s2263_s6 + $0x34] sm:$0xf]  ;;  %v1418_v29 = vor.u32 %v1581_v22, %v1417_v21 }
 0x10c   : > { %v1419_v26 = vld [vmem:[%s2263_s6 + $0x38] sm:$0xf0]  ;;  %v1588_v27 = vld [vmem:[%s2263_s6 + $0x74] sm:$0xf]  ;;  %v1450_v30 = vor.u32 %v1589_v24, %v1449_v23  ;;  %v578_v39 = vld [vmem:[#allocation2 + $0x40] sm:$0xff] }
 0x10d   : > { %v1451_v28 = vld [vmem:[%s2263_s6 + $0x78] sm:$0xf0]  ;;  %v1422_v31 = vor.u32 %v1580_v25, %v1419_v26  ;;  %v570_v34 = vld [vmem:[#allocation2 + $0x30] sm:$0xff]  ;;  %v579_v49 = vld [vmem:[#allocation2 + $0x20] sm:$0xff] }
 0x10e   : > { %814 = vmatpush.bf16.msra.mxu0 %v1593_v41  ;;  %1642 = vmatpush.bf16.msra.mxu2 %v1593_v41  ;;  %v1454_v32 = vor.u32 %v1588_v27, %v1451_v28  ;;  %v572_v53 = vld [vmem:[#allocation2 + $0x58] sm:$0xff]  ;;  %v574_v9 = vld [vmem:[#allocation2 + $0x50] sm:$0xff]  ;;  %v582_v15 = vld [vmem:[#allocation2 + $0x60] sm:$0xff] }
 0x10f   : > { %863 = vmatpush.bf16.msra.mxu1 %v1601_v42  ;;  %1650 = vmatpush.bf16.msra.mxu3 %v1601_v42  ;;  %v573_v63 = vld [vmem:[#allocation2 + $0x18] sm:$0xff]  ;;  %v583_v25 = vld [vmem:[#allocation2 + $0x70] sm:$0xff] }
 0x112   : > { %815 = vmatpush.bf16.msra.mxu0 %v1592_v43  ;;  %1643 = vmatpush.bf16.msra.mxu2 %v1592_v43  ;;  %v571_v43 = vld [vmem:[#allocation2] sm:$0xff] }
 0x113   : > { %864 = vmatpush.bf16.msra.mxu1 %v1600_v44  ;;  %1651 = vmatpush.bf16.msra.mxu3 %v1600_v44 }
 0x116   : > { %816 = vmatpush.bf16.msra.mxu0 %v1591_v45  ;;  %1644 = vmatpush.bf16.msra.mxu2 %v1591_v45 }
 0x117   : > { %865 = vmatpush.bf16.msra.mxu1 %v1599_v46  ;;  %1652 = vmatpush.bf16.msra.mxu3 %v1599_v46 }
 0x11a   : > { %817 = vmatpush.bf16.msra.mxu0 %v1590_v47  ;;  %1645 = vmatpush.bf16.msra.mxu2 %v1590_v47 }
 0x11b   : > { %866 = vmatpush.bf16.msra.mxu1 %v1598_v48  ;;  %1653 = vmatpush.bf16.msra.mxu3 %v1598_v48 }
 0x11d   : > { %818 = vmatmul.bf16.vlgmr.msra.gmra.mxu0 %v1394_v57  ;;  %838 = vmatmul.bf16.vlgmr.msra.gmra.mxu2 %v1426_v58 }
 0x11e   : > { %867 = vmatmul.bf16.vlgmr.msra.gmra.mxu1 %v1398_v59  ;;  %887 = vmatmul.bf16.vlgmr.msra.gmra.mxu3 %v1430_v60  ;;  %v580_v59 = vld [vmem:[#allocation2 + $0x10] sm:$0xff] }
 0x12d   : > { %823 = vmatmul.bf16.gmra.mxu0 %v1402_v5  ;;  %843 = vmatmul.bf16.gmra.mxu2 %v1434_v6  ;;  %v581_v5 = vld [vmem:[#allocation2 + $0x38] sm:$0xff] }
 0x12e   : > { %872 = vmatmul.bf16.gmra.mxu1 %v1406_v7  ;;  %892 = vmatmul.bf16.gmra.mxu3 %v1438_v8 }
 0x13d   : > { %828 = vmatmul.bf16.gmra.mxu0 %v1410_v17  ;;  %848 = vmatmul.bf16.gmra.mxu2 %v1442_v18 }
 0x13e   : > { %877 = vmatmul.bf16.gmra.mxu1 %v1414_v19  ;;  %897 = vmatmul.bf16.gmra.mxu3 %v1446_v20  ;;  %v575_v19 = vld [vmem:[#allocation2 + $0x68] sm:$0xff] }
 0x14d   : > { %833 = vmatmul.bf16.gmra.mxu0 %v1418_v29  ;;  %853 = vmatmul.bf16.gmra.mxu2 %v1450_v30  ;;  %v576_v29 = vld [vmem:[#allocation2 + $0x8] sm:$0xff] }
 0x14e   : > { %882 = vmatmul.bf16.gmra.mxu1 %v1422_v31  ;;  %902 = vmatmul.bf16.gmra.mxu3 %v1454_v32 }
 0x19a   : > { %v819_v33 = vpop.f32.mrf.mxu0 }
 0x19b   : > { %v868_v35 = vpop.f32.mrf.mxu1 }
 0x19c   : > { %v869_v36 = vadd.f32 %v868_v35, %v819_v33  ;;  %v584_v35 = vld [vmem:[#allocation2 + $0x78] sm:$0xff] }
 0x19e   : > { %v908_v37 = vadd.f32 %v869_v36, %v570_v34 }
 0x1a0   : > { %924 = vst [vmem:[#allocation2 + $0x30] sm:$0xff] %v908_v37  ;;  %v839_v38 = vpop.f32.mrf.mxu2 }
 0x1a1   : > { %v888_v40 = vpop.f32.mrf.mxu3 }
 0x1a2   : > { %v889_v41 = vadd.f32 %v888_v40, %v839_v38  ;;  %v821_v42 = vpop.f32.mrf.mxu0 }
 0x1a3   : > { %v870_v44 = vpop.f32.mrf.mxu1 }
 0x1a4   : > { %v916_v45 = vadd.f32 %v889_v41, %v578_v39  ;;  %v871_v46 = vadd.f32 %v870_v44, %v821_v42  ;;  %v577_v39 = vld [vmem:[#allocation2 + $0x48] sm:$0xff] }
 0x1a6   : > { %932 = vst [vmem:[#allocation2 + $0x40] sm:$0xff] %v916_v45  ;;  %v909_v47 = vadd.f32 %v871_v46, %v571_v43  ;;  %v585_v45 = vld [vmem:[#allocation2 + $0x28] sm:$0xff] }
 0x1a8   : > { %925 = vst [vmem:[#allocation2] sm:$0xff] %v909_v47  ;;  %v841_v48 = vpop.f32.mrf.mxu2 }
 0x1a9   : > { %v890_v50 = vpop.f32.mrf.mxu3 }
 0x1aa   : > { %v891_v51 = vadd.f32 %v890_v50, %v841_v48  ;;  %v824_v52 = vpop.f32.mrf.mxu0 }
 0x1ab   : > { %v873_v54 = vpop.f32.mrf.mxu1 }
 0x1ac   : > { %v917_v55 = vadd.f32 %v891_v51, %v579_v49  ;;  %v874_v56 = vadd.f32 %v873_v54, %v824_v52 }
 0x1ae   : > { %933 = vst [vmem:[#allocation2 + $0x20] sm:$0xff] %v917_v55  ;;  %v910_v57 = vadd.f32 %v874_v56, %v572_v53 }
 0x1b0   : > { %926 = vst [vmem:[#allocation2 + $0x58] sm:$0xff] %v910_v57  ;;  %v844_v58 = vpop.f32.mrf.mxu2 }
 0x1b1   : > { %v893_v60 = vpop.f32.mrf.mxu3 }
 0x1b2   : > { %v894_v61 = vadd.f32 %v893_v60, %v844_v58  ;;  %v826_v62 = vpop.f32.mrf.mxu0 }
 0x1b3   : > { %v875_v0 = vpop.f32.mrf.mxu1 }
 0x1b4   : > { %v918_v1 = vadd.f32 %v894_v61, %v580_v59  ;;  %v876_v2 = vadd.f32 %v875_v0, %v826_v62 }
 0x1b6   : > { %934 = vst [vmem:[#allocation2 + $0x10] sm:$0xff] %v918_v1  ;;  %v911_v3 = vadd.f32 %v876_v2, %v573_v63 }
 0x1b8   : > { %927 = vst [vmem:[#allocation2 + $0x18] sm:$0xff] %v911_v3  ;;  %v846_v4 = vpop.f32.mrf.mxu2 }
 0x1b9   : > { %v895_v6 = vpop.f32.mrf.mxu3 }
 0x1ba   : > { %v896_v7 = vadd.f32 %v895_v6, %v846_v4  ;;  %v829_v8 = vpop.f32.mrf.mxu0 }
 0x1bb   : > { %v878_v10 = vpop.f32.mrf.mxu1 }
 0x1bc   : > { %v919_v11 = vadd.f32 %v896_v7, %v581_v5  ;;  %v879_v12 = vadd.f32 %v878_v10, %v829_v8 }
 0x1be   : > { %935 = vst [vmem:[#allocation2 + $0x38] sm:$0xff] %v919_v11  ;;  %v912_v13 = vadd.f32 %v879_v12, %v574_v9 }
 0x1c0   : > { %928 = vst [vmem:[#allocation2 + $0x50] sm:$0xff] %v912_v13  ;;  %v849_v14 = vpop.f32.mrf.mxu2 }
 0x1c1   : > { %v898_v16 = vpop.f32.mrf.mxu3 }
 0x1c2   : > { %v899_v17 = vadd.f32 %v898_v16, %v849_v14  ;;  %v831_v18 = vpop.f32.mrf.mxu0 }
 0x1c3   : > { %v880_v20 = vpop.f32.mrf.mxu1 }
 0x1c4   : > { %v920_v21 = vadd.f32 %v899_v17, %v582_v15  ;;  %v881_v22 = vadd.f32 %v880_v20, %v831_v18 }
 0x1c6   : > { %936 = vst [vmem:[#allocation2 + $0x60] sm:$0xff] %v920_v21  ;;  %v913_v23 = vadd.f32 %v881_v22, %v575_v19 }
 0x1c8   : > { %929 = vst [vmem:[#allocation2 + $0x68] sm:$0xff] %v913_v23  ;;  %v851_v24 = vpop.f32.mrf.mxu2 }
 0x1c9   : > { %v900_v26 = vpop.f32.mrf.mxu3 }
 0x1ca   : > { %v901_v27 = vadd.f32 %v900_v26, %v851_v24  ;;  %v834_v28 = vpop.f32.mrf.mxu0 }
 0x1cb   : > { %v883_v30 = vpop.f32.mrf.mxu1 }
 0x1cc   : > { %v921_v31 = vadd.f32 %v901_v27, %v583_v25  ;;  %v884_v32 = vadd.f32 %v883_v30, %v834_v28 }
 0x1ce   : > { %937 = vst [vmem:[#allocation2 + $0x70] sm:$0xff] %v921_v31  ;;  %v914_v33 = vadd.f32 %v884_v32, %v576_v29 }
 0x1d0   : > { %930 = vst [vmem:[#allocation2 + $0x8] sm:$0xff] %v914_v33  ;;  %v854_v34 = vpop.f32.mrf.mxu2 }
 0x1d1   : > { %v903_v36 = vpop.f32.mrf.mxu3 }
 0x1d2   : > { %v904_v37 = vadd.f32 %v903_v36, %v854_v34  ;;  %v836_v38 = vpop.f32.mrf.mxu0 }
 0x1d3   : > { %v885_v40 = vpop.f32.mrf.mxu1 }
 0x1d4   : > { %v922_v41 = vadd.f32 %v904_v37, %v584_v35  ;;  %v886_v42 = vadd.f32 %v885_v40, %v836_v38 }
 0x1d6   : > { %938 = vst [vmem:[#allocation2 + $0x78] sm:$0xff] %v922_v41  ;;  %v915_v43 = vadd.f32 %v886_v42, %v577_v39 }
 0x1d8   : > { %931 = vst [vmem:[#allocation2 + $0x48] sm:$0xff] %v915_v43  ;;  %v856_v44 = vpop.f32.mrf.mxu2 }
 0x1d9   : > { %v905_v46 = vpop.f32.mrf.mxu3 }
 0x1da   : > { %v906_v47 = vadd.f32 %v905_v46, %v856_v44  ;;  %943 = sbr.rel (%p1519_p1) target bundleno = 681 (0x2a9), region = 68 }
 0x1dc   : > { %v923_v48 = vadd.f32 %v906_v47, %v585_v45 }
 0x1de   : > { %939 = vst [vmem:[#allocation2 + $0x28] sm:$0xff] %v923_v48 }
 0x1df   : > { %v1613_v49 = vld [vmem:[#allocation11 + $0x38] sm:$0xff]  ;;  %v1612_v50 = vld [vmem:[#allocation11 + $0x30] sm:$0xff]  ;;  %v1611_v51 = vld [vmem:[#allocation11 + $0x28] sm:$0xff] }
 0x1e0   : > { %1048 = vmatpush.bf16.msra.mxu0 %v1613_v49  ;;  %1654 = vmatpush.bf16.msra.mxu1 %v1613_v49  ;;  %v1610_v52 = vld [vmem:[#allocation11 + $0x20] sm:$0xff]  ;;  %v1609_v53 = vld [vmem:[#allocation11 + $0x18] sm:$0xff]  ;;  %v1608_v54 = vld [vmem:[#allocation11 + $0x10] sm:$0xff] }
 0x1e1   : > { %1655 = vmatpush.bf16.msra.mxu2 %v1613_v49  ;;  %1656 = vmatpush.bf16.msra.mxu3 %v1613_v49  ;;  %v1607_v55 = vld [vmem:[#allocation11 + $0x8] sm:$0xff]  ;;  %v1606_v56 = vld [vmem:[#allocation11] sm:$0xff]  ;;  %v944_v57 = vld [vmem:[#allocation2 + $0x30] sm:$0xff] }
 0x1e2   : > { %v945_v58 = vld [vmem:[#allocation2] sm:$0xff]  ;;  %v948_v59 = vld [vmem:[#allocation2 + $0x50] sm:$0xff]  ;;  %v949_v60 = vld [vmem:[#allocation2 + $0x68] sm:$0xff]  ;;  %1784 = vtanh.f32 %v944_v57 }
 0x1e3   : > { %v952_v61 = vld [vmem:[#allocation2 + $0x40] sm:$0xff]  ;;  %v2327_v0 = vld [vmem:[#allocation2 + $0x70] sm:$0xff]  ;;  %v976_v1 = vpack.c.bf16 %v945_v58, %v944_v57  ;;  %v978_v2 = vpack.c.bf16 %v949_v60, %v948_v59  ;;  %v2331_v5 = vld [vmem:[#allocation2 + $0x58] sm:$0xff]  ;;  %1786 = vtanh.f32 %v948_v59 }
 0x1e4   : > { %1049 = vmatpush.bf16.msra.mxu0 %v1612_v50  ;;  %1657 = vmatpush.bf16.msra.mxu1 %v1612_v50  ;;  %v2325_v62 = vld [vmem:[#allocation2 + $0x20] sm:$0xff]  ;;  %v2333_v6 = vld [vmem:[#allocation2 + $0x18] sm:$0xff]  ;;  %v2335_v7 = vld [vmem:[#allocation2 + $0x8] sm:$0xff] }
 0x1e5   : > { %1658 = vmatpush.bf16.msra.mxu2 %v1612_v50  ;;  %1659 = vmatpush.bf16.msra.mxu3 %v1612_v50  ;;  %v956_v63 = vld [vmem:[#allocation2 + $0x60] sm:$0xff]  ;;  %v980_v3 = vpack.c.bf16 %v2325_v62, %v952_v61  ;;  %v2337_v8 = vld [vmem:[#allocation2 + $0x48] sm:$0xff]  ;;  %v2339_v9 = vld [vmem:[#allocation2 + $0x10] sm:$0xff]  ;;  %v977_v13 = vpack.c.bf16 %v2333_v6, %v2331_v5 }
 0x1e6   : > { %v982_v4 = vpack.c.bf16 %v2327_v0, %v956_v63  ;;  %v2341_v10 = vld [vmem:[#allocation2 + $0x38] sm:$0xff]  ;;  %v2345_v12 = vld [vmem:[#allocation2 + $0x28] sm:$0xff]  ;;  %v979_v14 = vpack.c.bf16 %v2337_v8, %v2335_v7  ;;  %v960_v17 = vld [vmem:[#allocation12] sm:$0xff] }
 0x1e7   : > { %v2343_v11 = vld [vmem:[#allocation2 + $0x78] sm:$0xff]  ;;  %v981_v15 = vpack.c.bf16 %v2341_v10, %v2339_v9  ;;  %v964_v18 = vld [vmem:[#allocation12 + $0x20] sm:$0xff]  ;;  %v961_v25 = vld [vmem:[#allocation12 + $0x8] sm:$0xff] }
 0x1e8   : > { %1050 = vmatpush.bf16.msra.mxu0 %v1611_v51  ;;  %1660 = vmatpush.bf16.msra.mxu1 %v1611_v51  ;;  %v983_v16 = vpack.c.bf16 %v2345_v12, %v2343_v11  ;;  %v968_v23 = vld [vmem:[#allocation12 + $0x40] sm:$0xff]  ;;  %v965_v26 = vld [vmem:[#allocation12 + $0x28] sm:$0xff]  ;;  %v1785_v27 = vpop.eup %1784  ;;  %v962_v46 = vld [vmem:[#allocation12 + $0x10] sm:$0xff] }
 0x1e9   : > { %1661 = vmatpush.bf16.msra.mxu2 %v1611_v51  ;;  %1662 = vmatpush.bf16.msra.mxu3 %v1611_v51  ;;  %v972_v24 = vld [vmem:[#allocation12 + $0x60] sm:$0xff]  ;;  %v1787_v30 = vpop.eup %1786  ;;  %v969_v43 = vld [vmem:[#allocation12 + $0x48] sm:$0xff]  ;;  %v966_v47 = vld [vmem:[#allocation12 + $0x30] sm:$0xff] }
 0x1ea   : > { %v973_v44 = vld [vmem:[#allocation12 + $0x68] sm:$0xff] }
 0x1ec   : > { %1051 = vmatpush.bf16.msra.mxu0 %v1610_v52  ;;  %1663 = vmatpush.bf16.msra.mxu1 %v1610_v52 }
 0x1ed   : > { %1664 = vmatpush.bf16.msra.mxu2 %v1610_v52  ;;  %1665 = vmatpush.bf16.msra.mxu3 %v1610_v52 }
 0x1f0   : > { %1052 = vmatpush.bf16.msra.mxu0 %v1609_v53  ;;  %1666 = vmatpush.bf16.msra.mxu1 %v1609_v53 }
 0x1f1   : > { %1667 = vmatpush.bf16.msra.mxu2 %v1609_v53  ;;  %1668 = vmatpush.bf16.msra.mxu3 %v1609_v53 }
 0x1f4   : > { %1053 = vmatpush.bf16.msra.mxu0 %v1608_v54  ;;  %1669 = vmatpush.bf16.msra.mxu1 %v1608_v54 }
 0x1f5   : > { %1670 = vmatpush.bf16.msra.mxu2 %v1608_v54  ;;  %1671 = vmatpush.bf16.msra.mxu3 %v1608_v54 }
 0x1f8   : > { %1054 = vmatpush.bf16.msra.mxu0 %v1607_v55  ;;  %1672 = vmatpush.bf16.msra.mxu1 %v1607_v55 }
 0x1f9   : > { %1673 = vmatpush.bf16.msra.mxu2 %v1607_v55  ;;  %1674 = vmatpush.bf16.msra.mxu3 %v1607_v55 }
 0x1fc   : > { %1055 = vmatpush.bf16.msra.mxu0 %v1606_v56  ;;  %1675 = vmatpush.bf16.msra.mxu1 %v1606_v56 }
 0x1fd   : > { %1676 = vmatpush.bf16.msra.mxu2 %v1606_v56  ;;  %1677 = vmatpush.bf16.msra.mxu3 %v1606_v56 }
 0x1ff   : > { %1056 = vmatmul.bf16.vlgmr.msra.gmra.mxu0 %v976_v1  ;;  %1066 = vmatmul.bf16.vlgmr.msra.gmra.mxu1 %v978_v2 }
 0x200   : > { %1076 = vmatmul.bf16.vlgmr.msra.gmra.mxu2 %v980_v3  ;;  %1086 = vmatmul.bf16.vlgmr.msra.gmra.mxu3 %v982_v4  ;;  %v970_v3 = vld [vmem:[#allocation12 + $0x50] sm:$0xff] }
 0x201   : > { %v974_v4 = vld [vmem:[#allocation12 + $0x70] sm:$0xff] }
 0x20f   : > { %1061 = vmatmul.bf16.gmra.mxu0 %v977_v13  ;;  %1071 = vmatmul.bf16.gmra.mxu1 %v979_v14  ;;  %v967_v13 = vld [vmem:[#allocation12 + $0x38] sm:$0xff] }
 0x210   : > { %1081 = vmatmul.bf16.gmra.mxu2 %v981_v15  ;;  %1091 = vmatmul.bf16.gmra.mxu3 %v983_v16 }
 0x27c   : > { %v1057_v19 = vpop.f32.mrf.mxu0  ;;  %v1067_v20 = vpop.f32.mrf.mxu1 }
 0x27d   : > { %v1097_v21 = vadd.f32 %v1057_v19, %v960_v17  ;;  %v1101_v22 = vadd.f32 %v1067_v20, %v964_v18 }
 0x27f   : > { %1788 = vtanh.f32 %v1097_v21 }
 0x280   : > { %1790 = vtanh.f32 %v1101_v22 }
 0x281   : > { %1792 = vtanh.f32 %v945_v58 }
 0x282   : > { %1794 = vtanh.f32 %v949_v60 }
 0x283   : > { %v1077_v28 = vpop.f32.mrf.mxu2  ;;  %v1087_v29 = vpop.f32.mrf.mxu3  ;;  %1796 = vtanh.f32 %v952_v61 }
 0x284   : > { %v1105_v31 = vadd.f32 %v1077_v28, %v968_v23  ;;  %v1109_v32 = vadd.f32 %v1087_v29, %v972_v24  ;;  %v1059_v33 = vpop.f32.mrf.mxu0  ;;  %v1069_v34 = vpop.f32.mrf.mxu1  ;;  %1798 = vtanh.f32 %v956_v63 }
 0x285   : > { %v1789_v35 = vpop.eup %1788  ;;  %v1098_v36 = vadd.f32 %v1059_v33, %v961_v25  ;;  %v1102_v37 = vadd.f32 %v1069_v34, %v965_v26 }
 0x286   : > { %v1791_v38 = vpop.eup %1790  ;;  %v1145_v39 = vadd.f32 %v1789_v35, %v1785_v27  ;;  %1800 = vtanh.f32 %v1105_v31  ;;  %v975_v31 = vld [vmem:[#allocation12 + $0x78] sm:$0xff] }
 0x287   : > { %v1149_v40 = vadd.f32 %v1791_v38, %v1787_v30  ;;  %1802 = vtanh.f32 %v1109_v32  ;;  %v1793_v41 = vpop.eup %1792  ;;  %v971_v30 = vld [vmem:[#allocation12 + $0x58] sm:$0xff] }
 0x288   : > { %1161 = vst [vmem:[#allocation12] sm:$0xff] %v1145_v39  ;;  %1804 = vtanh.f32 %v1098_v36  ;;  %v1795_v42 = vpop.eup %1794 }
 0x289   : > { %1165 = vst [vmem:[#allocation12 + $0x20] sm:$0xff] %v1149_v40  ;;  %1806 = vtanh.f32 %v1102_v37  ;;  %v1797_v45 = vpop.eup %1796 }
 0x28a   : > { %1808 = vtanh.f32 %v2325_v62  ;;  %v1799_v48 = vpop.eup %1798 }
 0x28b   : > { %1810 = vtanh.f32 %v2327_v0  ;;  %v1079_v49 = vpop.f32.mrf.mxu2  ;;  %v1089_v50 = vpop.f32.mrf.mxu3 }
 0x28c   : > { %v1801_v51 = vpop.eup %1800  ;;  %1812 = vtanh.f32 %v2331_v5  ;;  %v1106_v52 = vadd.f32 %v1079_v49, %v969_v43  ;;  %v1110_v53 = vadd.f32 %v1089_v50, %v973_v44  ;;  %v1062_v54 = vpop.f32.mrf.mxu0 }
 0x28d   : > { %v1072_v55 = vpop.f32.mrf.mxu1  ;;  %v1803_v56 = vpop.eup %1802  ;;  %1814 = vtanh.f32 %v2335_v7  ;;  %v1153_v57 = vadd.f32 %v1801_v51, %v1797_v45  ;;  %v1099_v58 = vadd.f32 %v1062_v54, %v962_v46  ;;  %v963_v7 = vld [vmem:[#allocation12 + $0x18] sm:$0xff] }
 0x28e   : > { %v1103_v59 = vadd.f32 %v1072_v55, %v966_v47  ;;  %v1805_v60 = vpop.eup %1804  ;;  %v1157_v61 = vadd.f32 %v1803_v56, %v1799_v48  ;;  %1816 = vtanh.f32 %v1106_v52 }
 0x28f   : > { %v1807_v62 = vpop.eup %1806  ;;  %1169 = vst [vmem:[#allocation12 + $0x40] sm:$0xff] %v1153_v57  ;;  %v1146_v63 = vadd.f32 %v1805_v60, %v1793_v41  ;;  %1818 = vtanh.f32 %v1110_v53 }
 0x290   : > { %v1809_v0 = vpop.eup %1808  ;;  %1173 = vst [vmem:[#allocation12 + $0x60] sm:$0xff] %v1157_v61  ;;  %v1150_v1 = vadd.f32 %v1807_v62, %v1795_v42  ;;  %1820 = vtanh.f32 %v1099_v58 }
 0x291   : > { %v1811_v2 = vpop.eup %1810  ;;  %1162 = vst [vmem:[#allocation12 + $0x8] sm:$0xff] %v1146_v63  ;;  %1822 = vtanh.f32 %v1103_v59 }
 0x292   : > { %v1813_v5 = vpop.eup %1812  ;;  %1824 = vtanh.f32 %v2333_v6  ;;  %1166 = vst [vmem:[#allocation12 + $0x28] sm:$0xff] %v1150_v1 }
 0x293   : > { %v1815_v14 = vpop.eup %1814  ;;  %1826 = vtanh.f32 %v2337_v8  ;;  %v1082_v15 = vpop.f32.mrf.mxu2 }
 0x294   : > { %v1092_v16 = vpop.f32.mrf.mxu3  ;;  %v1817_v17 = vpop.eup %1816  ;;  %1828 = vtanh.f32 %v2339_v9  ;;  %v1107_v18 = vadd.f32 %v1082_v15, %v970_v3 }
 0x295   : > { %v1111_v19 = vadd.f32 %v1092_v16, %v974_v4  ;;  %v1064_v20 = vpop.f32.mrf.mxu0  ;;  %v1074_v21 = vpop.f32.mrf.mxu1  ;;  %1830 = vtanh.f32 %v2343_v11  ;;  %v1154_v23 = vadd.f32 %v1817_v17, %v1809_v0 }
 0x296   : > { %v1819_v22 = vpop.eup %1818  ;;  %v1100_v6 = vadd.f32 %v1064_v20, %v963_v7  ;;  %v1104_v24 = vadd.f32 %v1074_v21, %v967_v13  ;;  %1832 = vtanh.f32 %v1107_v18 }
 0x297   : > { %v1821_v25 = vpop.eup %1820  ;;  %v1158_v26 = vadd.f32 %v1819_v22, %v1811_v2  ;;  %1170 = vst [vmem:[#allocation12 + $0x48] sm:$0xff] %v1154_v23  ;;  %1834 = vtanh.f32 %v1111_v19 }
 0x298   : > { %v1823_v27 = vpop.eup %1822  ;;  %v1147_v8 = vadd.f32 %v1821_v25, %v1813_v5  ;;  %1836 = vtanh.f32 %v1100_v6 }
 0x299   : > { %v1825_v28 = vpop.eup %1824  ;;  %1174 = vst [vmem:[#allocation12 + $0x68] sm:$0xff] %v1158_v26  ;;  %v1151_v9 = vadd.f32 %v1823_v27, %v1815_v14  ;;  %1838 = vtanh.f32 %v1104_v24 }
 0x29a   : > { %v1827_v29 = vpop.eup %1826  ;;  %1163 = vst [vmem:[#allocation12 + $0x10] sm:$0xff] %v1147_v8  ;;  %1840 = vtanh.f32 %v2341_v10 }
 0x29b   : > { %v1829_v11 = vpop.eup %1828  ;;  %1167 = vst [vmem:[#allocation12 + $0x30] sm:$0xff] %v1151_v9  ;;  %v1084_v33 = vpop.f32.mrf.mxu2  ;;  %1842 = vtanh.f32 %v2345_v12 }
 0x29c   : > { %v1831_v32 = vpop.eup %1830  ;;  %v1094_v34 = vpop.f32.mrf.mxu3  ;;  %v1108_v36 = vadd.f32 %v1084_v33, %v971_v30 }
 0x29d   : > { %v1833_v35 = vpop.eup %1832  ;;  %v1112_v37 = vadd.f32 %v1094_v34, %v975_v31 }
 0x29e   : > { %v1835_v38 = vpop.eup %1834  ;;  %v1155_v39 = vadd.f32 %v1833_v35, %v1829_v11  ;;  %1844 = vtanh.f32 %v1108_v36 }
 0x29f   : > { %v1837_v40 = vpop.eup %1836  ;;  %v1159_v41 = vadd.f32 %v1835_v38, %v1831_v32  ;;  %1846 = vtanh.f32 %v1112_v37 }
 0x2a0   : > { %v1839_v42 = vpop.eup %1838  ;;  %1171 = vst [vmem:[#allocation12 + $0x50] sm:$0xff] %v1155_v39  ;;  %v1148_v43 = vadd.f32 %v1837_v40, %v1825_v28 }
 0x2a1   : > { %1175 = vst [vmem:[#allocation12 + $0x70] sm:$0xff] %v1159_v41  ;;  %v1152_v44 = vadd.f32 %v1839_v42, %v1827_v29  ;;  %v1841_v45 = vpop.eup %1840 }
 0x2a2   : > { %1164 = vst [vmem:[#allocation12 + $0x18] sm:$0xff] %v1148_v43  ;;  %v1843_v46 = vpop.eup %1842 }
 0x2a3   : > { %1168 = vst [vmem:[#allocation12 + $0x38] sm:$0xff] %v1152_v44 }
 0x2a4   : > { %v1845_v10 = vpop.eup %1844 }
 0x2a5   : > { %v1847_v47 = vpop.eup %1846  ;;  %v1156_v48 = vadd.f32 %v1845_v10, %v1841_v45 }
 0x2a6   : > { %v1160_v49 = vadd.f32 %v1847_v47, %v1843_v46 }
 0x2a7   : > { %1172 = vst [vmem:[#allocation12 + $0x58] sm:$0xff] %v1156_v48 }
 0x2a8   : > { %1176 = vst [vmem:[#allocation12 + $0x78] sm:$0xff] %v1160_v49 }
 0x2a9 PF: > { %p1722_p3 = scmp.eq.s32.totalorder %s2161_s24, 1  ;;  %s1187_s10 = sshll.u32 %s2392_s5, 4  ;;  %s1188_s10 = int_to_ptr.hbm [resolvable:$true] %s1187_s10 }
 0x2aa   : > { %s2099_s17 = smov [#allocation12]   ;;  %s2100_s12 = smov 128  }
 0x2ab   : > { %s1185_s11 = sshll.u32 %s2099_s17, 4  ;;  %s2101_s14 = smov 8   ;;  %s1186_s11 = int_to_ptr.vmem [resolvable:$true] %s1185_s11 }
 0x2ac   : > { %1695 = dma.vmem_to_hbm [thread:$0]  (%p1722_p3), %s1186_s11, 2048, %s1188_s10, [#allocation5], %s2100_s12, %s2100_s12, %s2101_s14  }
 0x2ad   : > { %2063 = dma.done.wait (%p1722_p3), [#allocation5], 2048  }
 0x2ae   : > { %2065 = vsyncadd (%p1722_p3), [#allocation5], 4294965248 }
 0x2af PF: > { %s21_s23 = sadd.s32 1, %s2088_s23   ;;  %s2411_s24 = sld [smem:[#allocation18_spill]] }
 0x2b0   : > { %p18_p4 = scmp.ge.s32.totalorder %s21_s23, 4   ;;  %s2412_s8 = sld [smem:[#allocation17_spill]] }
 0x2b1   : > { %s2413_s18 = smov %s2072_s19  ;;  %s2414_s19 = smov %s2076_s20 }
 0x2b2   : > { %s2416_s21 = smov %s2084_s22  ;;  %20 = sbr.rel (!%p18_p4) target bundleno = 10 (0xa), region = 111 }
 0x2b5   : > { %s2415_s20 = smov %s2411_s24 }
 0x2b6   : > { %s2417_s22 = smov %s2412_s8 }
 0x2b7   :  { %1204 = vsyncpa [#allocation4], 1 }
 0x2b8   :  { %1206 = vsyncpa [#allocation4 + $0x1], 1 }
 0x2b9   :  { %1207 = vsyncpa [#allocation7], 1 }
 0x2ba   :  { %1209 = vsyncpa [#allocation7 + $0x1], 1 }
 0x2bb   :  { %1210 = vsyncpa [#allocation10], 1 }
 0x2bc   :  { %1211 = vsyncpa [#allocation5], 1 }
 0x2bd   :  { %1213 = vsyncpa [#allocation5 + $0x1], 1 }

</bundles_post_ra>
